<compile_context>
chip_gen: v7x
topology: tpu7x:2x2x1
jax: 0.10.0
libtpu: 0.0.40
codegen_flags: <defaults>
</compile_context>

<pallas_src>
import numpy as np
import jax
import jax.numpy as jnp
from jax.experimental import pallas as pl
from jax.experimental.pallas import tpu as pltpu

_LANE = 128


def _make_moving_avg_matrix(L, kernel_size):
    """A[t, s] = weight of x[s] in the replicate-padded moving average at t."""
    assert kernel_size % 2 == 1, "series_decomp semantics assume odd kernel_size"
    hp = (kernel_size - 1) // 2
    A = np.zeros((L, L), np.float32)
    for t in range(L):
        for j in range(kernel_size):
            s = min(max(t - hp + j, 0), L - 1)
            A[t, s] += 1.0 / kernel_size
    return jnp.asarray(A)


def _choose_lane_tile(L, M, itemsize):
    """Lane tile for the channel axis.

    Full extent when M is small (< one lane group); otherwise the largest
    128-multiple whose pipelined VMEM footprint (double-buffered x/res/trend
    plus A, worst-case double-buffered) stays within a budget that is safe on
    v5e (16 MiB scoped default raised below), v6e (32 MiB) and v7x (64 MiB
    physical).
    """
    if M <= _LANE:
        return M
    budget = 40 << 20
    a_bytes = 2 * L * L * 4
    for tm in (2048, 1024, 512, 256, 128):
        if 6 * L * tm * itemsize + a_bytes <= budget:
            return tm
    return _LANE


def _decomp_kernel(x_ref, a_ref, res_ref, trend_ref):
    x = x_ref[...]                                   # (L, tm), native dtype
    xf = x.astype(jnp.float32)
    trend = jnp.dot(a_ref[...], xf, preferred_element_type=jnp.float32)
    trend_ref[...] = trend.astype(trend_ref.dtype)
    res_ref[...] = (xf - trend).astype(res_ref.dtype)


def series_decomp(x, kernel_size):
    """x: (B, L, M) -> (res, moving_mean), both (B, L, M), same dtype as x."""
    B, L, M = x.shape
    dtype = x.dtype
    itemsize = jnp.dtype(dtype).itemsize
    A = _make_moving_avg_matrix(L, kernel_size)

    tm = _choose_lane_tile(L, M, itemsize)
    Mp = ((M + tm - 1) // tm) * tm
    xp = x if Mp == M else jnp.pad(x, ((0, 0), (0, 0), (0, Mp - M)))

    grid = (B, Mp // tm)
    blk = (pl.Squeezed(), L, tm)
    io_map = lambda b, c: (b, 0, c)

    # Conservative VMEM estimate (double-buffer everything) + headroom,
    # clamped to stay below v7x's 64 MiB physical VMEM.
    need = 2 * 3 * L * tm * itemsize + 2 * L * L * 4
    vmem_limit = int(min(max(need + (4 << 20), 32 << 20), 56 << 20))

    res_p, trend_p = pl.pallas_call(
        _decomp_kernel,
        grid=grid,
        in_specs=[
            pl.BlockSpec(blk, io_map),
            pl.BlockSpec((L, L), lambda b, c: (0, 0),
                         pipeline_mode=pl.Buffered(1)),   # A: single-buffered
        ],
        out_specs=[
            pl.BlockSpec(blk, io_map),
            pl.BlockSpec(blk, io_map),
        ],
        out_shape=[
            jax.ShapeDtypeStruct((B, L, Mp), dtype),
            jax.ShapeDtypeStruct((B, L, Mp), dtype),
        ],
        compiler_params=pltpu.CompilerParams(
            dimension_semantics=("parallel", "parallel"),
            vmem_limit_bytes=vmem_limit),
    )(xp, A)

    if Mp != M:
        res_p = res_p[:, :, :M]
        trend_p = trend_p[:, :, :M]
    return res_p, trend_p


# Pure-JAX reference (mirrors the PyTorch module) for a correctness check.
def _series_decomp_ref(x, kernel_size):
    hp = (kernel_size - 1) // 2
    front = jnp.repeat(x[:, :1, :], hp, axis=1)
    end = jnp.repeat(x[:, -1:, :], hp, axis=1)
    xpad = jnp.concatenate([front, x, end], axis=1)             # (B, L+2hp, M)
    L = x.shape[1]
    windows = jnp.stack([xpad[:, i:i + L, :] for i in range(kernel_size)], axis=0)
    mean = jnp.mean(windows, axis=0)
    return x - mean, mean


if __name__ == "__main__":
    B, L, M = 2, 16, 4
    kernel_size = 5

    key = jax.random.PRNGKey(0)
    x = jax.random.normal(key, (B, L, M), dtype=jnp.float32)

    res, trend = series_decomp(x, kernel_size)
    res, trend = jax.block_until_ready((res, trend))

    res_ref, trend_ref = _series_decomp_ref(x, kernel_size)

    assert res.shape == (B, L, M) and trend.shape == (B, L, M)
    assert bool(jnp.all(jnp.isfinite(res))) and bool(jnp.all(jnp.isfinite(trend)))
    np.testing.assert_allclose(np.asarray(trend), np.asarray(trend_ref),
                               rtol=1e-5, atol=1e-5)
    np.testing.assert_allclose(np.asarray(res), np.asarray(res_ref),
                               rtol=1e-5, atol=1e-5)
    print("KERNEL_OK")
</pallas_src>

<mosaic_0001>
module attributes {stable_mosaic.version = 11 : i64} {
  func.func @_decomp_kernel(%arg0: i32, %arg1: i32, %arg2: memref<1x16x4xf32, #tpu.memory_space<vmem>>, %arg3: memref<16x16xf32, #tpu.memory_space<vmem>>, %arg4: memref<1x16x4xf32, #tpu.memory_space<vmem>>, %arg5: memref<1x16x4xf32, #tpu.memory_space<vmem>>) attributes {dimension_semantics = [#tpu.dimension_semantics<parallel>, #tpu.dimension_semantics<parallel>], iteration_bounds = array<i64: 2, 1>, scalar_prefetch = 0 : i64, scratch_operands = 0 : i64, tpu.core_type = #tpu.core_type<tc>, window_params = [{transform_indices = @transform_0, window_bounds = array<i64: 1, 16, 4>}, {pipeline_mode = #tpu.pipeline_mode<synchronous>, transform_indices = @transform_1, window_bounds = array<i64: 16, 16>}, {transform_indices = @transform_2, window_bounds = array<i64: 1, 16, 4>}, {transform_indices = @transform_3, window_bounds = array<i64: 1, 16, 4>}]} {
    %c0 = arith.constant 0 : index
    %c0_0 = arith.constant 0 : index
    %c0_1 = arith.constant 0 : index
    %0 = vector.load %arg2[%c0, %c0_0, %c0_1] : memref<1x16x4xf32, #tpu.memory_space<vmem>>, vector<1x16x4xf32>
    %1 = vector.shape_cast %0 : vector<1x16x4xf32> to vector<16x4xf32>
    %c0_2 = arith.constant 0 : index
    %c0_3 = arith.constant 0 : index
    %2 = vector.load %arg3[%c0_2, %c0_3] : memref<16x16xf32, #tpu.memory_space<vmem>>, vector<16x16xf32>
    %cst = arith.constant dense<0.000000e+00> : vector<16x4xf32>
    %3 = tpu.matmul %2, %1, %cst {dimension_numbers = #tpu.dot_dimension_numbers<[1], [0], [0], [1], [0, 0, 1, 1], [], []>} : vector<16x16xf32>, vector<16x4xf32>, vector<16x4xf32> -> vector<16x4xf32>
    %c0_4 = arith.constant 0 : index
    %c0_5 = arith.constant 0 : index
    %c0_6 = arith.constant 0 : index
    %4 = vector.load %arg5[%c0_4, %c0_5, %c0_6] : memref<1x16x4xf32, #tpu.memory_space<vmem>>, vector<1x16x4xf32>
    %5 = vector.shape_cast %4 : vector<1x16x4xf32> to vector<16x4xf32>
    %6 = vector.shape_cast %3 : vector<16x4xf32> to vector<1x16x4xf32>
    tpu.vector_store %arg5[%c0_4, %c0_5, %c0_6], %6 {strides = array<i32>} : memref<1x16x4xf32, #tpu.memory_space<vmem>>, vector<1x16x4xf32>,
    %7 = arith.subf %1, %3 : vector<16x4xf32>
    %c0_7 = arith.constant 0 : index
    %c0_8 = arith.constant 0 : index
    %c0_9 = arith.constant 0 : index
    %8 = vector.load %arg4[%c0_7, %c0_8, %c0_9] : memref<1x16x4xf32, #tpu.memory_space<vmem>>, vector<1x16x4xf32>
    %9 = vector.shape_cast %8 : vector<1x16x4xf32> to vector<16x4xf32>
    %10 = vector.shape_cast %7 : vector<16x4xf32> to vector<1x16x4xf32>
    tpu.vector_store %arg4[%c0_7, %c0_8, %c0_9], %10 {strides = array<i32>} : memref<1x16x4xf32, #tpu.memory_space<vmem>>, vector<1x16x4xf32>,
    return
  }
  func.func @transform_0(%arg0: i32, %arg1: i32) -> (i32, i32, i32) {
    %c0_i32 = arith.constant 0 : i32
    %c0_i32_0 = arith.constant 0 : i32
    return %arg0, %c0_i32, %arg1 : i32, i32, i32
  }
  func.func @transform_1(%arg0: i32, %arg1: i32) -> (i32, i32) {
    %c0_i32 = arith.constant 0 : i32
    %c0_i32_0 = arith.constant 0 : i32
    %c0_i32_1 = arith.constant 0 : i32
    return %c0_i32, %c0_i32_0 : i32, i32
  }
  func.func @transform_2(%arg0: i32, %arg1: i32) -> (i32, i32, i32) {
    %c0_i32 = arith.constant 0 : i32
    %c0_i32_0 = arith.constant 0 : i32
    return %arg0, %c0_i32, %arg1 : i32, i32, i32
  }
  func.func @transform_3(%arg0: i32, %arg1: i32) -> (i32, i32, i32) {
    %c0_i32 = arith.constant 0 : i32
    %c0_i32_0 = arith.constant 0 : i32
    return %arg0, %c0_i32, %arg1 : i32, i32, i32
  }
}

</mosaic_0001>

<bundles_post_ra>
// kernel: tpu_custom_call.1
= control target key start
LH: loop header
LB: loop body
LE: loop exit
PB: predicated region body
PF: predicated region fallthrough
CT: control target
= control target key end

     0   :  { %s547_s12 = smov 0   ;;  %s549_s13 = smov 0   ;;  %s589_s0 = inlined_call_operand.vmem [shape: f32[2,16,4], index: 0, kind: input, shape index: {}]   ;;  %s590_s1 = inlined_call_operand.vmem [shape: f32[16,16], index: 1, kind: input, shape index: {}]   ;;  %s591_s2 = inlined_call_operand.vmem [shape: f32[2,16,4], index: 2, kind: output, shape index: {0}]   ;;  %s592_s3 = inlined_call_operand.vmem [shape: f32[2,16,4], index: 3, kind: output, shape index: {1}]  }
   0x1   :  { %s551_s14 = smov 0  }
   0x2 LB: > { %s26_s15 = sadd.s32 1, %s521_s13  ;;  %p450_p0 = scmp.ge.s32.totalorder %s525_s14, 1  ;;  %s525_s14 = sphi %s551_s14, %s14_s14   ;;  %s521_s13 = sphi %s549_s13, %s594_s13   ;;  %s517_s12 = sphi %s547_s12, %s593_s12  }
   0x3   : > { %p28_p1 = scmp.ge.s32.totalorder %s26_s15, 2  ;;  %p161_p2 = scmp.lt.s32.totalorder %s525_s14, 3 }
   0x5   : > { %s596_s15 = smov (%p28_p1, %s26_s15), 0  ;;  %p162_p3 = pnand %p450_p0, %p161_p2 }
   0x6   : > { %p199_p4 = scmp.lt.s32.totalorder (!%p162_p3), %s517_s12, 1  ;;  %v225_v0 = vld [vmem:[%s590_s1] sm:$0xff] (!%p162_p3)  ;;  %vm227_vm0 = vcmask (!%p162_p3), 130048   ;;  %v226_v4 = vld [vmem:[%s590_s1 + $0x8] sm:$0xff] (!%p162_p3)  ;;  %vm309_vm1 = vcmask (!%p162_p3), 31744  }
   0x7   : > { %165 = sbr.rel (%p162_p3) target bundleno = 240 (0xf0), region = 28  ;;  %472 = vmatprep.mubr.msk.f32.mxu0 (!%p162_p3), %vm227_vm0, %v225_v0 }
   0xe   : > { %s598_s12 = smov (!%p199_p4, %s517_s12), 1 }
   0xf   : > { %s461_s18 = sshll.u32 %s598_s12, 4 }
  0x10   : > { %s206_s21 = scalar_lea.vmem %s589_s0, %s461_s18  ;;  %s222_s26 = scalar_lea.vmem %s592_s3, %s461_s18 }
  0x11   : > { %v223_v1 = vld [vmem:[%s206_s21] sm:$0xff]  ;;  %v224_v2 = vld [vmem:[%s206_s21 + $0x8] sm:$0xff]  ;;  %s214_s29 = scalar_lea.vmem %s591_s2, %s461_s18 }
  0x12   : > { %v475_v3 = vpack.c.bf16 %v224_v2, %v223_v1 }
  0x14   : > { %476 = vmatprep.subr.bf16.mxu0 %v475_v3 }
  0x15   : > { %478 = vmatpush3.bf16.msra.mxu0 %v475_v3 }
  0x18   : > { %473 = vmatmul.mubr.msk.f32.vlgmr.msra.gmra.mrb[0].mxu0 %vm227_vm0, %v226_v4 }
  0xeb   : > { %v474_v5 = vpop.f32.mrb[0].mxu0 }
  0xec   : > { %311 = vst.msk [vmem:[%s222_s26 + $0x8] sm:$0xff] %vm309_vm1, %v474_v5  ;;  %v313_v6 = vsub.f32 %v224_v2, %v474_v5  ;;  %v300_v7 = vpop.f32.mrb[1].mxu0 }
  0xed   : > { %310 = vst.msk [vmem:[%s222_s26] sm:$0xff] %vm309_vm1, %v300_v7  ;;  %v312_v8 = vsub.f32 %v223_v1, %v300_v7 }
  0xee   : > { %315 = vst.msk [vmem:[%s214_s29 + $0x8] sm:$0xff] %vm309_vm1, %v313_v6 }
  0xef   : > { %314 = vst.msk [vmem:[%s214_s29] sm:$0xff] %vm309_vm1, %v312_v8 }
  0xf0 PF: > { %s14_s14 = sadd.s32 1, %s525_s14   ;;  %s593_s12 = smov %s521_s13 }
  0xf1   : > { %p11_p5 = scmp.ge.s32.totalorder %s14_s14, 4   ;;  %s594_s13 = smov %s596_s15 }
  0xf3   :  { %13 = sbr.rel (!%p11_p5) target bundleno = 2 (0x2), region = 70 }

</bundles_post_ra>
